<compile_context>
chip_gen: v6e
topology: v6e:2x2x1
jax: 0.10.0
libtpu: 0.0.40
codegen_flags: <defaults>
</compile_context>

<pallas_src>
import jax
import jax.numpy as jnp
from jax import lax
from jax.experimental import pallas as pl
from jax.experimental.pallas import tpu as pltpu


# --------------------------------------------------------------------------
# Generation-aware VMEM budgets.
# --------------------------------------------------------------------------
def _vmem_capacity_bytes():
    try:
        return int(pltpu.get_tpu_info().vmem_capacity_bytes)
    except Exception:
        return 64 * 1024 * 1024          # conservative fallback: v7x per-TC VMEM


_VMEM_CAP = _vmem_capacity_bytes()
_VMEM_LIMIT = min((_VMEM_CAP * 3) // 4, 96 * 1024 * 1024)
_KV_RESIDENT_BUDGET = _VMEM_CAP // 3     # budget for double-buffered bf16 K+V

_TQ_TARGET = 1024                        # query tile target
_TK_TARGET = 1024                        # key tile target when K/V streamed
_TS_TARGET = 1024                        # projection tile target


def _round_up(n, m):
    return ((n + m - 1) // m) * m


def _pad_last(x, target):
    pad = target - x.shape[-1]
    if pad == 0:
        return x
    cfg = [(0, 0)] * (x.ndim - 1) + [(0, pad)]
    return jnp.pad(x, cfg)


def _pick_tile(s, target, multiple=16):
    """Largest tile <= target dividing s that is a multiple of `multiple`.

    Falls back to the full axis for awkward lengths (avoids tiny,
    overhead-dominated tiles).
    """
    if s <= target:
        return s
    for t in range(min(target, s), 0, -1):
        if s % t == 0 and t % multiple == 0:
            return t
    # TODO(synk): pad S up to a good tile + mask padded keys instead of
    # taking the whole axis for prime-ish sequence lengths.
    return s


# --------------------------------------------------------------------------
# Projection kernel for K / V:  y = x @ W + b   (W pre-transposed (in, out_p)).
# bf16 MXU operands, f32 accumulation, bf16 output.
# --------------------------------------------------------------------------
def _kv_linear_kernel(x_ref, w_ref, b_ref, o_ref):
    x = x_ref[0].astype(jnp.bfloat16)                           # (ts, D)
    w = w_ref[...].astype(jnp.bfloat16)                          # (D, out_p)
    y = jnp.dot(x, w, preferred_element_type=jnp.float32)
    y = y + b_ref[...].astype(jnp.float32)                       # broadcast (1, out_p)
    o_ref[0] = y.astype(o_ref.dtype)


def _project(x, w, b):
    B, S, D = x.shape
    out_p = w.shape[1]
    ts = _pick_tile(S, _TS_TARGET, 16)
    # W/b block indices are constant across the grid -> fetched once.
    # TODO(synk): pipeline_mode=pl.Buffered(1) on W/b would also drop their
    # second (double-buffer) VMEM reservation on v7x.
    return pl.pallas_call(
        _kv_linear_kernel,
        out_shape=jax.ShapeDtypeStruct((B, S, out_p), jnp.bfloat16),
        grid_spec=pltpu.PrefetchScalarGridSpec(
            num_scalar_prefetch=0,
            grid=(B, S // ts),
            in_specs=[
                pl.BlockSpec((1, ts, D), lambda b, s: (b, s, 0)),    # x tile
                pl.BlockSpec((D, out_p), lambda b, s: (0, 0)),       # W (const)
                pl.BlockSpec((1, out_p), lambda b, s: (0, 0)),       # b (const)
            ],
            out_specs=pl.BlockSpec((1, ts, out_p), lambda b, s: (b, s, 0)),
        ),
        compiler_params=pltpu.CompilerParams(
            dimension_semantics=("parallel", "parallel"),
            vmem_limit_bytes=_VMEM_LIMIT),
    )(x, w, b)


# --------------------------------------------------------------------------
# Flash attention kernel with fused (pre-scaled) Q projection.
# --------------------------------------------------------------------------
def _flash_kernel(q_ref, wq_ref, bq_ref, k_ref, v_ref, o_ref,
                  q_sc, m_sc, l_sc, acc_sc):
    ki = pl.program_id(2)

    @pl.when(ki == 0)
    def _():
        # Project this query tile once per (b, qi); scale already folded in Wq/bq.
        xq = q_ref[0].astype(jnp.bfloat16)                       # (tq, D)
        wq = wq_ref[...].astype(jnp.bfloat16)                    # (D, dqk_p)
        qp = jnp.dot(xq, wq, preferred_element_type=jnp.float32)
        qp = qp + bq_ref[...].astype(jnp.float32)
        q_sc[...] = qp.astype(jnp.bfloat16)
        m_sc[...] = jnp.full_like(m_sc, -jnp.inf)
        l_sc[...] = jnp.zeros_like(l_sc)
        acc_sc[...] = jnp.zeros_like(acc_sc)

    k = k_ref[0]                                                 # (tk, dqk_p) bf16
    v = v_ref[0]                                                 # (tk, dv_p)  bf16

    # Scores for this (query tile, key tile): contract on feature axis (bf16 MXU).
    s = lax.dot_general(q_sc[...], k,
                        dimension_numbers=(((1,), (1,)), ((), ())),
                        preferred_element_type=jnp.float32)       # (tq, tk) f32

    m_prev = m_sc[...]
    m_new = jnp.maximum(m_prev, jnp.max(s, axis=-1, keepdims=True))
    alpha = jnp.exp(m_prev - m_new)                               # (tq, 1)
    # TODO(synk): on v6e/v7x compute exp in bf16 (EUP bf16 path) with an f32
    # sum for l; kept f32 here so the same kernel is optimal on v5e too.
    p = jnp.exp(s - m_new)                                        # (tq, tk) f32

    l_sc[...] = alpha * l_sc[...] + jnp.sum(p, axis=-1, keepdims=True)
    acc_sc[...] = alpha * acc_sc[...] + jnp.dot(
        p.astype(jnp.bfloat16), v, preferred_element_type=jnp.float32)
    m_sc[...] = m_new

    @pl.when(ki == pl.num_programs(2) - 1)
    def _():
        inv_l = pl.reciprocal(l_sc[...], approx=True)             # EUP slot
        o_ref[0] = (acc_sc[...] * inv_l).astype(o_ref.dtype)


def _flash_attention(q_raw, wq_p, bq_p, K, V, out_dtype):
    B, Sq, D = q_raw.shape
    _, Sk, dqk_p = K.shape
    dv_p = V.shape[2]

    tq = _pick_tile(Sq, _TQ_TARGET, 16)

    # Whole-K/V residency when the double-buffered bf16 K+V fits the budget;
    # otherwise stream key tiles.  (Keeps the same kernel structure on all gens.)
    kv_resident_bytes = 2 * Sk * (dqk_p + dv_p) * 2               # 2 bufs * bf16
    if kv_resident_bytes <= _KV_RESIDENT_BUDGET:
        tk = Sk
    else:
        tk = _pick_tile(Sk, _TK_TARGET, 16)

    return pl.pallas_call(
        _flash_kernel,
        out_shape=jax.ShapeDtypeStruct((B, Sq, dv_p), out_dtype),
        grid_spec=pltpu.PrefetchScalarGridSpec(
            num_scalar_prefetch=0,
            grid=(B, Sq // tq, Sk // tk),
            in_specs=[
                pl.BlockSpec((1, tq, D), lambda b, qi, ki: (b, qi, 0)),      # raw q
                pl.BlockSpec((D, dqk_p), lambda b, qi, ki: (0, 0)),          # Wq (const)
                pl.BlockSpec((1, dqk_p), lambda b, qi, ki: (0, 0)),          # bq (const)
                pl.BlockSpec((1, tk, dqk_p), lambda b, qi, ki: (b, ki, 0)),  # K
                pl.BlockSpec((1, tk, dv_p), lambda b, qi, ki: (b, ki, 0)),   # V
            ],
            out_specs=pl.BlockSpec((1, tq, dv_p), lambda b, qi, ki: (b, qi, 0)),
            scratch_shapes=[
                pltpu.VMEM((tq, dqk_p), jnp.bfloat16),  # projected Q (per query tile)
                pltpu.VMEM((tq, 1), jnp.float32),       # m (running max)
                pltpu.VMEM((tq, 1), jnp.float32),       # l (running denom)
                pltpu.VMEM((tq, dv_p), jnp.float32),    # acc
            ],
        ),
        compiler_params=pltpu.CompilerParams(
            dimension_semantics=("parallel", "parallel", "arbitrary"),
            vmem_limit_bytes=_VMEM_LIMIT),
    )(q_raw, wq_p, bq_p, K, V)


# --------------------------------------------------------------------------
# Public wrapper.  q: (B, Sq, D), k/v: (B, Sk, D).
# params: Wq/Wk/Wv pre-transposed to (D, out_dim), biases (1, out_dim).
# --------------------------------------------------------------------------
@jax.jit
def attention_forward(q, k, v, params):
    wq, bq = params["wq"], params["bq"]
    wk, bk = params["wk"], params["bk"]
    wv, bv = params["wv"], params["bv"]
    q_dim, k_dim, v_dim = wq.shape[1], wk.shape[1], wv.shape[1]
    assert q_dim == k_dim, "Q @ K^T requires q_dim == k_dim"

    scale = 1.0 / (k_dim ** 0.5)
    dqk_p = _round_up(q_dim, 128)     # lane-pad contraction dim
    dv_p = _round_up(v_dim, 128)      # lane-pad output dim (dense vst)

    # Fold the softmax scale into the Q projection; zero-pad to lane width.
    wq_p = _pad_last(wq * scale, dqk_p)
    bq_p = _pad_last(bq * scale, dqk_p)
    wk_p = _pad_last(wk, dqk_p)
    bk_p = _pad_last(bk, dqk_p)
    wv_p = _pad_last(wv, dv_p)
    bv_p = _pad_last(bv, dv_p)

    # TODO(synk): when k and v are statically the same array (self-attention),
    # fuse the K/V projections into one pallas_call via concatenated weights.
    K = _project(k, wk_p, bk_p)       # (B, Sk, dqk_p) bf16
    V = _project(v, wv_p, bv_p)       # (B, Sk, dv_p)  bf16

    out = _flash_attention(q, wq_p, bq_p, K, V, q.dtype)   # (B, Sq, dv_p)
    return out[..., :v_dim]


def _reference(q, k, v, params):
    Q = q @ params["wq"] + params["bq"]
    K = k @ params["wk"] + params["bk"]
    V = v @ params["wv"] + params["bv"]
    s = jnp.einsum("bqd,bkd->bqk", Q, K) / (params["wk"].shape[1] ** 0.5)
    p = jax.nn.softmax(s, axis=-1)
    return jnp.einsum("bqk,bkd->bqd", p, V)


if __name__ == "__main__":
    # Small deterministic example.
    B, Sq, Sk = 2, 8, 8
    attention_dim, q_dim, k_dim, v_dim = 32, 16, 16, 32

    key = jax.random.PRNGKey(0)
    kq, kk, kv, kwq, kwk, kwv, kbq, kbk, kbv = jax.random.split(key, 9)

    q = jax.random.normal(kq, (B, Sq, attention_dim), dtype=jnp.float32)
    k = jax.random.normal(kk, (B, Sk, attention_dim), dtype=jnp.float32)
    v = jax.random.normal(kv, (B, Sk, attention_dim), dtype=jnp.float32)

    # PyTorch Linear stores (out, in); we use the transposed (in, out) layout.
    wscale = 1.0 / (attention_dim ** 0.5)
    params = {
        "wq": wscale * jax.random.normal(kwq, (attention_dim, q_dim), jnp.float32),
        "wk": wscale * jax.random.normal(kwk, (attention_dim, k_dim), jnp.float32),
        "wv": wscale * jax.random.normal(kwv, (attention_dim, v_dim), jnp.float32),
        "bq": 0.01 * jax.random.normal(kbq, (1, q_dim), jnp.float32),
        "bk": 0.01 * jax.random.normal(kbk, (1, k_dim), jnp.float32),
        "bv": 0.01 * jax.random.normal(kbv, (1, v_dim), jnp.float32),
    }

    out = attention_forward(q, k, v, params)
    out = jax.block_until_ready(out)

    ref = _reference(q, k, v, params)
    assert out.shape == (B, Sq, v_dim)
    # bf16 MXU operands / bf16 K,V intermediates + approx reciprocal ->
    # compare against the f32 reference with a correspondingly loose tolerance.
    assert jnp.allclose(out, ref, atol=5e-2, rtol=5e-2), "mismatch vs reference"

    print("KERNEL_OK")
</pallas_src>

<mosaic_0001>
module attributes {stable_mosaic.version = 11 : i64} {
  func.func @_kv_linear_kernel(%arg0: i32, %arg1: i32, %arg2: memref<1x8x32xf32, #tpu.memory_space<vmem>>, %arg3: memref<32x128xf32, #tpu.memory_space<vmem>>, %arg4: memref<1x128xf32, #tpu.memory_space<vmem>>, %arg5: memref<1x8x128xbf16, #tpu.memory_space<vmem>>) attributes {dimension_semantics = [#tpu.dimension_semantics<parallel>, #tpu.dimension_semantics<parallel>], iteration_bounds = array<i64: 2, 1>, scalar_prefetch = 0 : i64, scratch_operands = 0 : i64, tpu.core_type = #tpu.core_type<tc>, window_params = [{transform_indices = @transform_0, window_bounds = array<i64: 1, 8, 32>}, {pipeline_mode = #tpu.pipeline_mode<synchronous>, transform_indices = @transform_1, window_bounds = array<i64: 32, 128>}, {pipeline_mode = #tpu.pipeline_mode<synchronous>, transform_indices = @transform_2, window_bounds = array<i64: 1, 128>}, {transform_indices = @transform_3, window_bounds = array<i64: 1, 8, 128>}]} {
    %c0 = arith.constant 0 : index
    %c0_0 = arith.constant 0 : index
    %c0_1 = arith.constant 0 : index
    %0 = vector.load %arg2[%c0, %c0_0, %c0_1] : memref<1x8x32xf32, #tpu.memory_space<vmem>>, vector<1x8x32xf32>
    %1 = vector.shape_cast %0 : vector<1x8x32xf32> to vector<8x32xf32>
    %2 = arith.truncf %1 : vector<8x32xf32> to vector<8x32xbf16>
    %c0_2 = arith.constant 0 : index
    %c0_3 = arith.constant 0 : index
    %3 = vector.load %arg3[%c0_2, %c0_3] : memref<32x128xf32, #tpu.memory_space<vmem>>, vector<32x128xf32>
    %4 = arith.truncf %3 : vector<32x128xf32> to vector<32x128xbf16>
    %cst = arith.constant dense<0.000000e+00> : vector<8x128xf32>
    %5 = tpu.matmul %2, %4, %cst {dimension_numbers = #tpu.dot_dimension_numbers<[1], [0], [0], [1], [0, 0, 1, 1], [], []>} : vector<8x32xbf16>, vector<32x128xbf16>, vector<8x128xf32> -> vector<8x128xf32>
    %c0_4 = arith.constant 0 : index
    %c0_5 = arith.constant 0 : index
    %6 = vector.load %arg4[%c0_4, %c0_5] : memref<1x128xf32, #tpu.memory_space<vmem>>, vector<1x128xf32>
    %7 = vector.broadcast %6 : vector<1x128xf32> to vector<8x128xf32>
    %8 = arith.addf %5, %7 : vector<8x128xf32>
    %9 = arith.truncf %8 : vector<8x128xf32> to vector<8x128xbf16>
    %c0_6 = arith.constant 0 : index
    %c0_7 = arith.constant 0 : index
    %c0_8 = arith.constant 0 : index
    %10 = vector.load %arg5[%c0_6, %c0_7, %c0_8] : memref<1x8x128xbf16, #tpu.memory_space<vmem>>, vector<1x8x128xbf16>
    %11 = vector.shape_cast %10 : vector<1x8x128xbf16> to vector<8x128xbf16>
    %12 = vector.shape_cast %9 : vector<8x128xbf16> to vector<1x8x128xbf16>
    tpu.vector_store %arg5[%c0_6, %c0_7, %c0_8], %12 {strides = array<i32>} : memref<1x8x128xbf16, #tpu.memory_space<vmem>>, vector<1x8x128xbf16>,
    return
  }
  func.func @transform_0(%arg0: i32, %arg1: i32) -> (i32, i32, i32) {
    %c0_i32 = arith.constant 0 : i32
    %c0_i32_0 = arith.constant 0 : i32
    return %arg0, %arg1, %c0_i32 : i32, i32, i32
  }
  func.func @transform_1(%arg0: i32, %arg1: i32) -> (i32, i32) {
    %c0_i32 = arith.constant 0 : i32
    %c0_i32_0 = arith.constant 0 : i32
    %c0_i32_1 = arith.constant 0 : i32
    return %c0_i32, %c0_i32_0 : i32, i32
  }
  func.func @transform_2(%arg0: i32, %arg1: i32) -> (i32, i32) {
    %c0_i32 = arith.constant 0 : i32
    %c0_i32_0 = arith.constant 0 : i32
    %c0_i32_1 = arith.constant 0 : i32
    return %c0_i32, %c0_i32_0 : i32, i32
  }
  func.func @transform_3(%arg0: i32, %arg1: i32) -> (i32, i32, i32) {
    %c0_i32 = arith.constant 0 : i32
    %c0_i32_0 = arith.constant 0 : i32
    return %arg0, %arg1, %c0_i32 : i32, i32, i32
  }
}

module attributes {stable_mosaic.version = 11 : i64} {
  func.func @_flash_kernel(%arg0: i32, %arg1: i32, %arg2: i32, %arg3: memref<1x8x32xf32, #tpu.memory_space<vmem>>, %arg4: memref<32x128xf32, #tpu.memory_space<vmem>>, %arg5: memref<1x128xf32, #tpu.memory_space<vmem>>, %arg6: memref<1x8x128xbf16, #tpu.memory_space<vmem>>, %arg7: memref<1x8x128xbf16, #tpu.memory_space<vmem>>, %arg8: memref<1x8x128xf32, #tpu.memory_space<vmem>>, %arg9: memref<8x128xbf16, #tpu.memory_space<vmem>>, %arg10: memref<8x1xf32, #tpu.memory_space<vmem>>, %arg11: memref<8x1xf32, #tpu.memory_space<vmem>>, %arg12: memref<8x128xf32, #tpu.memory_space<vmem>>) attributes {dimension_semantics = [#tpu.dimension_semantics<parallel>, #tpu.dimension_semantics<parallel>, #tpu.dimension_semantics<arbitrary>], iteration_bounds = array<i64: 2, 1, 1>, scalar_prefetch = 0 : i64, scratch_operands = 4 : i64, tpu.core_type = #tpu.core_type<tc>, window_params = [{transform_indices = @transform_0, window_bounds = array<i64: 1, 8, 32>}, {pipeline_mode = #tpu.pipeline_mode<synchronous>, transform_indices = @transform_1, window_bounds = array<i64: 32, 128>}, {pipeline_mode = #tpu.pipeline_mode<synchronous>, transform_indices = @transform_2, window_bounds = array<i64: 1, 128>}, {transform_indices = @transform_3, window_bounds = array<i64: 1, 8, 128>}, {transform_indices = @transform_4, window_bounds = array<i64: 1, 8, 128>}, {transform_indices = @transform_5, window_bounds = array<i64: 1, 8, 128>}]} {
    %c0_i32 = arith.constant 0 : i32
    %0 = arith.cmpi eq, %arg2, %c0_i32 : i32
    %1 = arith.extui %0 : i1 to i32
    %c0_i32_0 = arith.constant 0 : i32
    %2 = arith.cmpi ne, %1, %c0_i32_0 : i32
    scf.if %2 {
      %c0_25 = arith.constant 0 : index
      %c0_26 = arith.constant 0 : index
      %c0_27 = arith.constant 0 : index
      %35 = vector.load %arg3[%c0_25, %c0_26, %c0_27] : memref<1x8x32xf32, #tpu.memory_space<vmem>>, vector<1x8x32xf32>
      %36 = vector.shape_cast %35 : vector<1x8x32xf32> to vector<8x32xf32>
      %37 = arith.truncf %36 : vector<8x32xf32> to vector<8x32xbf16>
      %c0_28 = arith.constant 0 : index
      %c0_29 = arith.constant 0 : index
      %38 = vector.load %arg4[%c0_28, %c0_29] : memref<32x128xf32, #tpu.memory_space<vmem>>, vector<32x128xf32>
      %39 = arith.truncf %38 : vector<32x128xf32> to vector<32x128xbf16>
      %cst_30 = arith.constant dense<0.000000e+00> : vector<8x128xf32>
      %40 = tpu.matmul %37, %39, %cst_30 {dimension_numbers = #tpu.dot_dimension_numbers<[1], [0], [0], [1], [0, 0, 1, 1], [], []>} : vector<8x32xbf16>, vector<32x128xbf16>, vector<8x128xf32> -> vector<8x128xf32>
      %c0_31 = arith.constant 0 : index
      %c0_32 = arith.constant 0 : index
      %41 = vector.load %arg5[%c0_31, %c0_32] : memref<1x128xf32, #tpu.memory_space<vmem>>, vector<1x128xf32>
      %42 = vector.broadcast %41 : vector<1x128xf32> to vector<8x128xf32>
      %43 = arith.addf %40, %42 : vector<8x128xf32>
      %44 = arith.truncf %43 : vector<8x128xf32> to vector<8x128xbf16>
      %c0_33 = arith.constant 0 : index
      %c0_34 = arith.constant 0 : index
      %45 = vector.load %arg9[%c0_33, %c0_34] : memref<8x128xbf16, #tpu.memory_space<vmem>>, vector<8x128xbf16>
      tpu.vector_store %arg9[%c0_33, %c0_34], %44 {strides = array<i32>} : memref<8x128xbf16, #tpu.memory_space<vmem>>, vector<8x128xbf16>,
      %cst_35 = arith.constant 0xFF800000 : f32
      %46 = vector.broadcast %cst_35 : f32 to vector<8x1xf32>
      %c0_36 = arith.constant 0 : index
      %c0_37 = arith.constant 0 : index
      %47 = vector.load %arg10[%c0_36, %c0_37] : memref<8x1xf32, #tpu.memory_space<vmem>>, vector<8x1xf32>
      tpu.vector_store %arg10[%c0_36, %c0_37], %46 {strides = array<i32>} : memref<8x1xf32, #tpu.memory_space<vmem>>, vector<8x1xf32>,
      %cst_38 = arith.constant 0.000000e+00 : f32
      %48 = vector.broadcast %cst_38 : f32 to vector<8x1xf32>
      %c0_39 = arith.constant 0 : index
      %c0_40 = arith.constant 0 : index
      %49 = vector.load %arg11[%c0_39, %c0_40] : memref<8x1xf32, #tpu.memory_space<vmem>>, vector<8x1xf32>
      tpu.vector_store %arg11[%c0_39, %c0_40], %48 {strides = array<i32>} : memref<8x1xf32, #tpu.memory_space<vmem>>, vector<8x1xf32>,
      %cst_41 = arith.constant 0.000000e+00 : f32
      %50 = vector.broadcast %cst_41 : f32 to vector<8x128xf32>
      %c0_42 = arith.constant 0 : index
      %c0_43 = arith.constant 0 : index
      %51 = vector.load %arg12[%c0_42, %c0_43] : memref<8x128xf32, #tpu.memory_space<vmem>>, vector<8x128xf32>
      tpu.vector_store %arg12[%c0_42, %c0_43], %50 {strides = array<i32>} : memref<8x128xf32, #tpu.memory_space<vmem>>, vector<8x128xf32>,
    } else {
    }
    %c0 = arith.constant 0 : index
    %c0_1 = arith.constant 0 : index
    %c0_2 = arith.constant 0 : index
    %3 = vector.load %arg6[%c0, %c0_1, %c0_2] : memref<1x8x128xbf16, #tpu.memory_space<vmem>>, vector<1x8x128xbf16>
    %4 = vector.shape_cast %3 : vector<1x8x128xbf16> to vector<8x128xbf16>
    %c0_3 = arith.constant 0 : index
    %c0_4 = arith.constant 0 : index
    %c0_5 = arith.constant 0 : index
    %5 = vector.load %arg7[%c0_3, %c0_4, %c0_5] : memref<1x8x128xbf16, #tpu.memory_space<vmem>>, vector<1x8x128xbf16>
    %6 = vector.shape_cast %5 : vector<1x8x128xbf16> to vector<8x128xbf16>
    %c0_6 = arith.constant 0 : index
    %c0_7 = arith.constant 0 : index
    %7 = vector.load %arg9[%c0_6, %c0_7] : memref<8x128xbf16, #tpu.memory_space<vmem>>, vector<8x128xbf16>
    %cst = arith.constant dense<0.000000e+00> : vector<8x8xf32>
    %8 = tpu.matmul %7, %4, %cst {dimension_numbers = #tpu.dot_dimension_numbers<[1], [1], [0], [0], [0, 0, 1, 0], [], []>} : vector<8x128xbf16>, vector<8x128xbf16>, vector<8x8xf32> -> vector<8x8xf32>
    %c0_8 = arith.constant 0 : index
    %c0_9 = arith.constant 0 : index
    %9 = vector.load %arg10[%c0_8, %c0_9] : memref<8x1xf32, #tpu.memory_space<vmem>>, vector<8x1xf32>
    %cst_10 = arith.constant dense<0xFF800000> : vector<8xf32>
    %10 = vector.multi_reduction <maximumf>, %8, %cst_10 [1] : vector<8x8xf32> to vector<8xf32>
    %11 = vector.shape_cast %10 : vector<8xf32> to vector<8x1xf32>
    %12 = arith.maximumf %9, %11 : vector<8x1xf32>
    %13 = arith.subf %9, %12 : vector<8x1xf32>
    %14 = math.exp %13 : vector<8x1xf32>
    %15 = vector.broadcast %12 : vector<8x1xf32> to vector<8x8xf32>
    %16 = arith.subf %8, %15 : vector<8x8xf32>
    %17 = math.exp %16 : vector<8x8xf32>
    %c0_11 = arith.constant 0 : index
    %c0_12 = arith.constant 0 : index
    %18 = vector.load %arg11[%c0_11, %c0_12] : memref<8x1xf32, #tpu.memory_space<vmem>>, vector<8x1xf32>
    %19 = arith.mulf %14, %18 : vector<8x1xf32>
    %cst_13 = arith.constant dense<0.000000e+00> : vector<8xf32>
    %20 = vector.multi_reduction <add>, %17, %cst_13 [1] : vector<8x8xf32> to vector<8xf32>
    %21 = vector.shape_cast %20 : vector<8xf32> to vector<8x1xf32>
    %22 = arith.addf %19, %21 : vector<8x1xf32>
    %c0_14 = arith.constant 0 : index
    %c0_15 = arith.constant 0 : index
    %23 = vector.load %arg11[%c0_14, %c0_15] : memref<8x1xf32, #tpu.memory_space<vmem>>, vector<8x1xf32>
    tpu.vector_store %arg11[%c0_14, %c0_15], %22 {strides = array<i32>} : memref<8x1xf32, #tpu.memory_space<vmem>>, vector<8x1xf32>,
    %c0_16 = arith.constant 0 : index
    %c0_17 = arith.constant 0 : index
    %24 = vector.load %arg12[%c0_16, %c0_17] : memref<8x128xf32, #tpu.memory_space<vmem>>, vector<8x128xf32>
    %25 = vector.broadcast %14 : vector<8x1xf32> to vector<8x128xf32>
    %26 = arith.mulf %25, %24 : vector<8x128xf32>
    %27 = arith.truncf %17 : vector<8x8xf32> to vector<8x8xbf16>
    %cst_18 = arith.constant dense<0.000000e+00> : vector<8x128xf32>
    %28 = tpu.matmul %27, %6, %cst_18 {dimension_numbers = #tpu.dot_dimension_numbers<[1], [0], [0], [1], [0, 0, 1, 1], [], []>} : vector<8x8xbf16>, vector<8x128xbf16>, vector<8x128xf32> -> vector<8x128xf32>
    %29 = arith.addf %26, %28 : vector<8x128xf32>
    %c0_19 = arith.constant 0 : index
    %c0_20 = arith.constant 0 : index
    %30 = vector.load %arg12[%c0_19, %c0_20] : memref<8x128xf32, #tpu.memory_space<vmem>>, vector<8x128xf32>
    tpu.vector_store %arg12[%c0_19, %c0_20], %29 {strides = array<i32>} : memref<8x128xf32, #tpu.memory_space<vmem>>, vector<8x128xf32>,
    %c0_21 = arith.constant 0 : index
    %c0_22 = arith.constant 0 : index
    %31 = vector.load %arg10[%c0_21, %c0_22] : memref<8x1xf32, #tpu.memory_space<vmem>>, vector<8x1xf32>
    tpu.vector_store %arg10[%c0_21, %c0_22], %12 {strides = array<i32>} : memref<8x1xf32, #tpu.memory_space<vmem>>, vector<8x1xf32>,
    %c0_i32_23 = arith.constant 0 : i32
    %32 = arith.cmpi eq, %arg2, %c0_i32_23 : i32
    %33 = arith.extui %32 : i1 to i32
    %c0_i32_24 = arith.constant 0 : i32
    %34 = arith.cmpi ne, %33, %c0_i32_24 : i32
    scf.if %34 {
      %c0_25 = arith.constant 0 : index
      %c0_26 = arith.constant 0 : index
      %35 = vector.load %arg11[%c0_25, %c0_26] : memref<8x1xf32, #tpu.memory_space<vmem>>, vector<8x1xf32>
      %36 = tpu.reciprocal %35 {approx = true} : vector<8x1xf32> -> vector<8x1xf32>
      %c0_27 = arith.constant 0 : index
      %c0_28 = arith.constant 0 : index
      %37 = vector.load %arg12[%c0_27, %c0_28] : memref<8x128xf32, #tpu.memory_space<vmem>>, vector<8x128xf32>
      %38 = vector.broadcast %36 : vector<8x1xf32> to vector<8x128xf32>
      %39 = arith.mulf %37, %38 : vector<8x128xf32>
      %c0_29 = arith.constant 0 : index
      %c0_30 = arith.constant 0 : index
      %c0_31 = arith.constant 0 : index
      %40 = vector.load %arg8[%c0_29, %c0_30, %c0_31] : memref<1x8x128xf32, #tpu.memory_space<vmem>>, vector<1x8x128xf32>
      %41 = vector.shape_cast %40 : vector<1x8x128xf32> to vector<8x128xf32>
      %42 = vector.shape_cast %39 : vector<8x128xf32> to vector<1x8x128xf32>
      tpu.vector_store %arg8[%c0_29, %c0_30, %c0_31], %42 {strides = array<i32>} : memref<1x8x128xf32, #tpu.memory_space<vmem>>, vector<1x8x128xf32>,
    } else {
    }
    return
  }
  func.func @transform_0(%arg0: i32, %arg1: i32, %arg2: i32) -> (i32, i32, i32) {
    %c0_i32 = arith.constant 0 : i32
    %c0_i32_0 = arith.constant 0 : i32
    return %arg0, %arg1, %c0_i32 : i32, i32, i32
  }
  func.func @transform_1(%arg0: i32, %arg1: i32, %arg2: i32) -> (i32, i32) {
    %c0_i32 = arith.constant 0 : i32
    %c0_i32_0 = arith.constant 0 : i32
    %c0_i32_1 = arith.constant 0 : i32
    return %c0_i32, %c0_i32_0 : i32, i32
  }
  func.func @transform_2(%arg0: i32, %arg1: i32, %arg2: i32) -> (i32, i32) {
    %c0_i32 = arith.constant 0 : i32
    %c0_i32_0 = arith.constant 0 : i32
    %c0_i32_1 = arith.constant 0 : i32
    return %c0_i32, %c0_i32_0 : i32, i32
  }
  func.func @transform_3(%arg0: i32, %arg1: i32, %arg2: i32) -> (i32, i32, i32) {
    %c0_i32 = arith.constant 0 : i32
    %c0_i32_0 = arith.constant 0 : i32
    return %arg0, %arg2, %c0_i32 : i32, i32, i32
  }
  func.func @transform_4(%arg0: i32, %arg1: i32, %arg2: i32) -> (i32, i32, i32) {
    %c0_i32 = arith.constant 0 : i32
    %c0_i32_0 = arith.constant 0 : i32
    return %arg0, %arg2, %c0_i32 : i32, i32, i32
  }
  func.func @transform_5(%arg0: i32, %arg1: i32, %arg2: i32) -> (i32, i32, i32) {
    %c0_i32 = arith.constant 0 : i32
    %c0_i32_0 = arith.constant 0 : i32
    return %arg0, %arg1, %c0_i32 : i32, i32, i32
  }
}

</mosaic_0001>

<bundles_post_ra>
// kernel: attention_forward.3
= control target key start
LH: loop header
LB: loop body
LE: loop exit
PB: predicated region body
PF: predicated region fallthrough
CT: control target
= control target key end

     0   :  { %s427_s12 = smov 0   ;;  %s429_s13 = smov 0   ;;  %s475_s0 = inlined_call_operand.vmem [shape: f32[2,8,32], index: 0, kind: input, shape index: {}]   ;;  %s476_s1 = inlined_call_operand.vmem [shape: f32[32,128], index: 1, kind: input, shape index: {}]   ;;  %s477_s2 = inlined_call_operand.vmem [shape: f32[1,128], index: 2, kind: input, shape index: {}]   ;;  %s478_s3 = inlined_call_operand.vmem [shape: bf16[2,8,128], index: 3, kind: output, shape index: {}]  }
   0x1   :  { %s431_s14 = smov 0  }
   0x2 LB: > { %s25_s15 = sadd.s32 1, %s399_s13  ;;  %p337_p0 = scmp.ge.s32.totalorder %s403_s14, 1  ;;  %s403_s14 = sphi %s431_s14, %s13_s14   ;;  %s399_s13 = sphi %s429_s13, %s480_s13   ;;  %s395_s12 = sphi %s427_s12, %s479_s12  }
   0x3   : > { %p27_p1 = scmp.ge.s32.totalorder %s25_s15, 2  ;;  %p155_p2 = scmp.lt.s32.totalorder %s403_s14, 3 }
   0x5   : > { %s482_s15 = smov (%p27_p1, %s25_s15), 0  ;;  %p156_p3 = pnand %p337_p0, %p155_p2 }
   0x6   : > { %p183_p4 = scmp.lt.s32.totalorder (!%p156_p3), %s395_s12, 1 }
   0x7   : > { %159 = sbr.rel (%p156_p3) target bundleno = 221 (0xdd), region = 32 }
   0xc   : > { %v202_v0 = vld [vmem:[%s476_s1 + $0x10] sm:$0xff]  ;;  %v203_v1 = vld [vmem:[%s476_s1 + $0x18] sm:$0xff]  ;;  %v200_v2 = vld [vmem:[%s476_s1] sm:$0xff]  ;;  %v405_v3 = vmov 0.0   ;;  %vm406_vm0 = vmmov 0   ;;  %s484_s12 = smov (!%p183_p4, %s395_s12), 1 }
   0xd   : > { %347 = vmatprep.subr.bf16.mxu0 %v405_v3  ;;  %v205_v4 = vpack.c.bf16 %v203_v1, %v202_v0  ;;  %v201_v5 = vld [vmem:[%s476_s1 + $0x8] sm:$0xff]  ;;  %351 = vmatprep.mubr.msk.bf16.mxu0 %vm406_vm0, %v405_v3  ;;  %s338_s24 = sshll.u32 %s484_s12, 3  ;;  %vm213_vm1 = vcmask 261120   ;;  %v340_v9 = vld [vmem:[%s477_s2] ss:$0 sm:$0xff]  ;;  %s339_s30 = sshll.u32 %s484_s12, 2 }
   0xe   : > { %v204_v6 = vpack.c.bf16 %v201_v5, %v200_v2  ;;  %s189_s27 = scalar_lea.vmem %s475_s0, %s338_s24  ;;  %s196_s6 = scalar_lea.vmem %s478_s3, %s339_s30 }
   0xf   : > { %348 = vmatpush3.bf16.msra.mxu0 %v205_v4  ;;  %v198_v7 = vld [vmem:[%s189_s27] sm:$0xff] }
  0x10   : > { %349 = vmatprep.subr.bf16.mxu0 %v405_v3  ;;  %v199_v8 = vpack.c.bf16 %v198_v7, %v198_v7 }
  0x13   : > { %350 = vmatpush3.bf16.msra.mxu0 %v204_v6 }
  0x16   : > { %352 = vmatmul.mubr.msk.bf16.vlgmr.msra.gmra.mxu0 %vm213_vm1, %v199_v8 }
  0xd6   : > { %v251_v10 = vpop.f32.mrf.mxu0 }
  0xd7   : > { %v252_v11 = vadd.f32 %v340_v9, %v251_v10 }
  0xd8   : > { %v353_v12 = vpop.f32.mrf.mxu0 }
  0xd9   : > { %v257_v13 = vpack.c.bf16 %v252_v11, %v252_v11 }
  0xda   : > { %v254_v14 = vpop.f32.mrf.mxu0 }
  0xdb   : > { %258 = vst [vmem:[%s196_s6] sm:$0xf] %v257_v13 }
  0xdc   : > { %v354_v15 = vpop.f32.mrf.mxu0 }
  0xdd PF: > { %s13_s14 = sadd.s32 1, %s403_s14   ;;  %s479_s12 = smov %s399_s13 }
  0xde   : > { %p10_p5 = scmp.ge.s32.totalorder %s13_s14, 4   ;;  %s480_s13 = smov %s482_s15 }
  0xe0   :  { %12 = sbr.rel (!%p10_p5) target bundleno = 2 (0x2), region = 62 }

// kernel: attention_forward.5
= control target key start
LH: loop header
LB: loop body
LE: loop exit
PB: predicated region body
PF: predicated region fallthrough
CT: control target
= control target key end

     0   :  { %10 = vsyncpa [#allocation7], 0  ;;  %s993_s0 = inlined_call_operand.vmem [shape: f32[2,8,32], index: 0, kind: input, shape index: {}]   ;;  %s994_s1 = inlined_call_operand.vmem [shape: f32[32,128], index: 1, kind: input, shape index: {}]   ;;  %s995_s2 = inlined_call_operand.vmem [shape: f32[1,128], index: 2, kind: input, shape index: {}]   ;;  %s996_s3 = inlined_call_operand.vmem [shape: bf16[2,8,128], index: 3, kind: input, shape index: {}]   ;;  %s997_s4 = inlined_call_operand.vmem [shape: bf16[2,8,128], index: 4, kind: input, shape index: {}]   ;;  %s998_s5 = inlined_call_operand.hbm [shape: f32[2,8,128], index: 5, kind: output, shape index: {}]  }
   0x1   :  { %12 = vsyncpa [#allocation7 + $0x1], 0  ;;  %s859_s18 = smov 0   ;;  %s861_s19 = smov 0  }
   0x2   :  { %s863_s20 = smov 0   ;;  %s865_s21 = smov 0  }
   0x3   :  { %s867_s22 = smov 0   ;;  %s869_s23 = smov 0  }
   0x4 LB: > { %s636_s24 = sadd.s32 4294967295, %s822_s23   ;;  %s637_s25 = sadd.s32 4294967294, %s822_s23   ;;  %s822_s23 = sphi %s869_s23, %s18_s23   ;;  %s818_s22 = sphi %s867_s22, %s1005_s22   ;;  %s814_s21 = sphi %s865_s21, %s1004_s21   ;;  %s810_s20 = sphi %s863_s20, %s1003_s20   ;;  %s806_s19 = sphi %s861_s19, %s1002_s19   ;;  %s802_s18 = sphi %s859_s18, %s1001_s18  }
   0x5   : > { %s37_s26 = sadd.s32 1, %s818_s22  ;;  %s172_s27 = sadd.s32 1, %s810_s20 }
   0x6   : > { %p39_p0 = scmp.ge.s32.totalorder %s37_s26, 2  ;;  %p182_p1 = scmp.ne.s32.totalorder %s810_s20, %s806_s19 }
   0x7   : > { %p183_p2 = scmp.eq.s32.totalorder %s636_s24, 1  ;;  %p188_p3 = scmp.ne.s32.totalorder %s806_s19, %s802_s18 }
   0x8   : > { %s1007_s26 = smov (%p39_p0, %s37_s26), 0  ;;  %p189_p5 = scmp.eq.s32.totalorder %s637_s25, 1 }
   0x9   : > { %p899_p4 = por %p183_p2, %p182_p1  ;;  %s167_s29 = ssub.s32 %s818_s22, %s1007_s26 }
   0xa   : > { %p640_p6 = scmp.ge.s32.totalorder %s822_s23, 1  ;;  %p170_p7 = scmp.eq.s32.totalorder %s167_s29, 0 }
   0xb   : > { %p906_p8 = por %p189_p5, %p188_p3  ;;  %p243_p9 = scmp.lt.s32.totalorder %s822_s23, 3 }
   0xc   : > { %s912_s6 = scalar_select %p170_p7, %s810_s20, %s172_s27  }
   0xd   : > { %p244_p10 = pnand %p640_p6, %p243_p9 }
   0xe   : > { %p287_p11 = scmp.lt.s32.totalorder (!%p244_p10), %s814_s21, 1  ;;  %s284_s14 = sand.u32 (!%p244_p10), 1, %s806_s19  }
   0xf   : > { %247 = sbr.rel (%p244_p10) target bundleno = 1013 (0x3f5), region = 40  ;;  %s518_s7 = scalar_lea.sflag (!%p244_p10), [#allocation7], %s284_s14 }
  0x10   : > { %s828_s9 = smov (!%p244_p10), [#allocation6]  }
  0x11   : > { %s750_s10 = sshll.u32 (!%p244_p10), %s828_s9, 4  ;;  %s751_s10 = int_to_ptr.vmem [resolvable:$false] %s750_s10 }
  0x14   : > { %v317_v0 = vld [vmem:[%s994_s1 + $0x10] sm:$0xff]  ;;  %v318_v1 = vld [vmem:[%s994_s1 + $0x18] sm:$0xff]  ;;  %v315_v2 = vld [vmem:[%s994_s1] sm:$0xff]  ;;  %v824_v3 = vmov 0.0   ;;  %vm825_vm0 = vmmov 0   ;;  %s929_s15 = scalar_select %p287_p11, %s814_s21, 1 }
  0x15   : > { %659 = vmatprep.subr.bf16.mxu0 %v824_v3  ;;  %v320_v4 = vpack.c.bf16 %v318_v1, %v317_v0  ;;  %v316_v5 = vld [vmem:[%s994_s1 + $0x8] sm:$0xff]  ;;  %663 = vmatprep.mubr.msk.bf16.mxu0 %vm825_vm0, %v824_v3  ;;  %vm328_vm1 = vcmask 261120   ;;  %v645_v10 = vld [vmem:[%s995_s2] ss:$0 sm:$0xff]  ;;  %vm374_vm2 = vcmask 7168   ;;  %v826_v18 = vmov -inf  }
  0x16   : > { %667 = vmatprep.subr.bf16.mxu1 %v824_v3  ;;  %669 = vmatprep.mubr.msk.bf16.mxu1 %vm825_vm0, %v824_v3  ;;  %v319_v6 = vpack.c.bf16 %v316_v5, %v315_v2  ;;  %s642_s16 = sshll.u32 %s929_s15, 3  ;;  %s643_s27 = sshll.u32 %s929_s15, 2  ;;  %375 = vst.msk [vmem:[#allocation3] sm:$0xff] %vm374_vm2, %v826_v18  ;;  %376 = vst.msk [vmem:[#allocation4] sm:$0xff] %vm374_vm2, %v824_v3  ;;  %vm422_vm3 = vcmask 64512   ;;  %v827_v24 = vmov 0  }
  0x17   : > { %660 = vmatpush3.bf16.msra.mxu0 %v320_v4  ;;  %s293_s25 = scalar_lea.vmem %s993_s0, %s642_s16  ;;  %s300_s8 = scalar_lea.vmem %s996_s3, %s643_s27  ;;  %738 = vset.pattern.permute.xlu0 %v827_v24  ;;  %vm457_vm4 = vcmask 1043456  }
  0x18   : > { %661 = vmatprep.subr.bf16.mxu0 %v824_v3  ;;  %v313_v7 = vld [vmem:[%s293_s25] sm:$0xff]  ;;  %739 = vset.pattern.permute.xlu1 %v827_v24  ;;  %s307_s13 = scalar_lea.vmem %s997_s4, %s643_s27  ;;  %s641_s15 = sshll.u32 %s284_s14, 3 }
  0x19   : > { %v314_v8 = vpack.c.bf16 %v313_v7, %v313_v7  ;;  %v378_v9 = vld [vmem:[%s300_s8] sm:$0xf]  ;;  %s649_s16 = sshll.u32 %s814_s21, 7  ;;  %s286_s17 = scalar_lea.vmem [#allocation6], %s641_s15 }
  0x1a   : > { %668 = vmatpush3.bf16.xpose.msra.mxu1 %v378_v9  ;;  %v379_v27 = vld [vmem:[%s307_s13] sm:$0xf]  ;;  %s532_s24 = sshll.u32 %s286_s17, 4  ;;  %s530_s29 = scalar_lea.hbm %s998_s5, %s649_s16  ;;  %s533_s24 = int_to_ptr.vmem [resolvable:$true] %s532_s24 }
  0x1b   : > { %662 = vmatpush3.bf16.msra.mxu0 %v319_v6  ;;  %v459_v30 = vsel %vm457_vm4, %v379_v27, 0  ;;  %s746_s8 = scalar_lea.vmem %s533_s24, 128  ;;  %s752_s21 = scalar_lea.vmem %s751_s10, 256 }
  0x1c   : > { %673 = vmatprep.subr.bf16.mxu0 %v824_v3  ;;  %p747_p12 = scmp.ne.s32.totalorder %s533_s24, %s746_s8  ;;  %p753_p1 = scmp.lt.s32.totalorder %s533_s24, %s751_s10 }
  0x1d   : > { %v421_v25 = vld [vmem:[#allocation3] sm:$0xff]  ;;  %v438_v39 = vld [vmem:[#allocation4] sm:$0xff]  ;;  %p754_p2 = scmp.lt.s32.totalorder %s752_s21, %s746_s8 }
  0x1e   : > { %664 = vmatmul.mubr.msk.bf16.vlgmr.msra.gmra.mxu0 %vm328_vm1, %v314_v8  ;;  %p748_p13 = pnand %p747_p12, %p899_p4 }
  0x1f   : > { %675 = vmatprep.mubr.msk.bf16.mxu0 %vm825_vm0, %v824_v3  ;;  %674 = vmatpush3.bf16.msra.mxu0 %v459_v30  ;;  %p755_p3 = por %p754_p2, %p753_p1 }
  0x20   : > { %p749_p0 = pneg %p748_p13 }
  0x22   : > { %p756_p5 = pnand %p755_p3, %p749_p0 }
  0xde   : > { %v366_v11 = vpop.f32.mrf.mxu0 }
  0xdf   : > { %v367_v12 = vadd.f32 %v645_v10, %v366_v11 }
  0xe0   : > { %v665_v13 = vpop.f32.mrf.mxu0 }
  0xe1   : > { %v372_v14 = vpack.c.bf16 %v367_v12, %v367_v12 }
  0xe2   : > { %v369_v15 = vpop.f32.mrf.mxu0 }
  0xe3   : > { %373 = vst [vmem:[#allocation2] sm:$0xf] %v372_v14 }
  0xe4   : > { %v666_v16 = vpop.f32.mrf.mxu0 }
  0xea   : > { %v380_v17 = vld [vmem:[#allocation2] sm:$0xf] }
  0xeb   : > { %670 = vmatmul.mubr.bf16.vlgmr.msra.gmra.mxu1 %v380_v17 }
 0x1ab   : > { %v415_v19 = vpop.f32.mrf.mxu1 }
 0x1ac   : > { %v423_v20 = vsel %vm422_vm3, %v415_v19, -inf }
 0x1ad   : > { %424 = vmax.xlane.f32.xlu0 %v423_v20  ;;  %v671_v21 = vpop.f32.mrf.mxu1 }
 0x1af   : > { %v418_v22 = vpop.f32.mrf.mxu1 }
 0x1b1   : > { %v672_v23 = vpop.f32.mrf.mxu1 }
 0x236   : > { %v425_v26 = vpop.xlane.xlu0 %424 }
 0x237   : > { %v426_v28 = vmax.f32 %v421_v25, %v425_v26 }
 0x239   : > { %v427_v29 = vsub.f32 %v421_v25, %v426_v28  ;;  %503 = vst.msk [vmem:[#allocation3] sm:$0xff] %vm374_vm2, %v426_v28  ;;  %432 = vperm.xlu0 %738, %v426_v28  }
 0x23b   : > { %v428_v35 = vmul.f32 1.442695, %v427_v29 }
 0x2b4   : > { %v433_v31 = vpop.permute.xlu0 %432 }
 0x2b5   : > { %v435_v32 = vsub.f32 %v415_v19, %v433_v31 }
 0x2b7   : > { %v436_v33 = vmul.f32 1.442695, %v435_v32 }
 0x2b9   : > { %740 = vpow2.f32 %v436_v33 }
 0x2ba   : > { %742 = vpow2.f32 %v428_v35 }
 0x2c6   : > { %v741_v34 = vpop.eup %740 }
 0x2c7   : > { %v440_v36 = vsel %vm422_vm3, %v741_v34, 0.0  ;;  %v453_v37 = vpack.c.bf16 %v741_v34, %v741_v34  ;;  %v743_v38 = vpop.eup %742 }
 0x2c8   : > { %441 = vadd.xlane.f32.xlu1 %v440_v36  ;;  %v439_v40 = vmul.f32 %v743_v38, %v438_v39 }
 0x2c9   : > { %676 = vmatmul.mubr.msk.bf16.vlgmr.msra.gmra.mxu0 %vm422_vm3, %v453_v37 }
 0x2d9   : > { %449 = vperm.xlu1 %739, %v743_v38  }
 0x351   : > { %v442_v41 = vpop.xlane.xlu1 %441 }
 0x352   : > { %v443_v42 = vadd.f32 %v442_v41, %v439_v40 }
 0x354   : > { %445 = vst.msk [vmem:[#allocation4] sm:$0xff] %vm374_vm2, %v443_v42 }
 0x355   : > { %v450_v49 = vpop.permute.xlu1 %449 }
 0x356   : > { %v452_v50 = vmul.f32 0.0, %v450_v49 }
 0x35b   : > { %v507_v43 = vld [vmem:[#allocation4] sm:$0xff] }
 0x35c   : > { %744 = vrcp.f32 %v507_v43 }
 0x369   : > { %v745_v44 = vpop.eup %744 }
 0x36a   : > { %512 = vperm.xlu1 %739, %v745_v44  }
 0x389   : > { %v495_v45 = vpop.f32.mrf.mxu0 }
 0x38a   : > { %v501_v51 = vadd.f32 %v495_v45, %v452_v50 }
 0x38b   : > { %v677_v46 = vpop.f32.mrf.mxu0 }
 0x38d   : > { %v498_v47 = vpop.f32.mrf.mxu0 }
 0x38f   : > { %v678_v48 = vpop.f32.mrf.mxu0 }
 0x3e5   : > { %v513_v52 = vpop.permute.xlu1 %512 }
 0x3e6   : > { %v515_v53 = vmul.f32 %v513_v52, %v501_v51 }
 0x3e8   : > { %516 = vst [vmem:[%s286_s17] sm:$0xff] %v515_v53 }
 0x3e9   : > { %759 = shalt.err (!%p756_p5)
}
 0x3ea   : > { %s760_s11 = scalar_lea.hbm %s530_s29, 128  ;;  %s764_s14 = scalar_lea.hbm %s998_s5, 256 }
 0x3eb   : > { %p761_p6 = scmp.ne.s32.totalorder %s530_s29, %s760_s11  ;;  %p765_p10 = scmp.lt.s32.totalorder %s530_s29, %s998_s5 }
 0x3ec   : > { %p766_p11 = scmp.lt.s32.totalorder %s764_s14, %s760_s11 }
 0x3ed   : > { %p762_p7 = pnand %p761_p6, %p899_p4 }
 0x3ee   : > { %p767_p12 = por %p766_p11, %p765_p10 }
 0x3ef   : > { %p763_p9 = pneg %p762_p7 }
 0x3f1   : > { %p768_p13 = pnand %p767_p12, %p763_p9 }
 0x3f3   : > { %771 = shalt.err (!%p768_p13)
}
 0x3f4   : > { %679 = dma.vmem_to_hbm [thread:$0]  (%p899_p4), %s533_s24, 128, %s530_s29, %s518_s7  }
 0x3f5 PF: > { %p685_p0 = scmp.ge.s32.totalorder %s822_s23, 2  ;;  %s544_s17 = sand.u32 1, %s802_s18  }
 0x3f6   : > { %s545_s25 = scalar_lea.sflag [#allocation7], %s544_s17 }
 0x3f7   : > { %p682_p1 = pnand %p685_p0, %p906_p8 }
 0x3f9   : > { %p683_p2 = pneg %p682_p1 }
 0x3fb   : > { %797 = dma.done.wait (%p683_p2), %s545_s25, 128  }
 0x3fc   : > { %799 = vsyncadd (%p683_p2), %s545_s25, 4294967168  ;;  %s18_s23 = sadd.s32 1, %s822_s23   ;;  %s1001_s18 = smov %s806_s19 }
 0x3fd   : > { %p15_p3 = scmp.ge.s32.totalorder %s18_s23, 4   ;;  %s1002_s19 = smov %s810_s20 }
 0x3fe   : > { %s1003_s20 = smov %s912_s6  ;;  %s1004_s21 = smov %s818_s22 }
 0x3ff   : > { %s1005_s22 = smov %s1007_s26  ;;  %17 = sbr.rel (!%p15_p3) target bundleno = 4 (0x4), region = 89 }
 0x404   :  { %550 = vsyncpa [#allocation7], 1 }
 0x405   :  { %552 = vsyncpa [#allocation7 + $0x1], 1 }

</bundles_post_ra>
